<compile_context>
chip_gen: v7x
topology: tpu7x:2x2x1
jax: 0.10.0
libtpu: 0.0.40
codegen_flags: <defaults>
</compile_context>

<pallas_src>
import jax
import jax.numpy as jnp
from jax.experimental import pallas as pl
from jax.experimental.pallas import tpu as pltpu

NUM_LAYERS = 12          # 6 Linear(2,2) per E module, 2 E modules
FEAT = 2
LANE = 128
SUBLANE = 8

# Composition plan: consecutive affine layers between activations.
#   layers 0..3  -> relu, layers 4..5  -> sigmoid,
#   layers 6..9  -> relu, layers 10..11 -> sigmoid
STAGE_SLICES = ((0, 4), (4, 6), (6, 10), (10, 12))
NUM_STAGES = len(STAGE_SLICES)


def _compose_affines(weights, biases):
    """Fold runs of Linear(2,2) layers into NUM_STAGES effective affines.

    weights: (12, 2, 2) in PyTorch (out, in) layout; biases: (12, 2).
    Returns (NUM_STAGES, 2, 2) and (NUM_STAGES, 2) such that applying
    `y = x @ Wc.T + bc` per stage reproduces the layer-by-layer chain.
    """
    ws, bs = [], []
    for lo, hi in STAGE_SLICES:
        W = jnp.eye(FEAT, dtype=jnp.float32)
        b = jnp.zeros((FEAT,), dtype=jnp.float32)
        for i in range(lo, hi):
            Wi = weights[i].astype(jnp.float32)
            bi = biases[i].astype(jnp.float32)
            W = Wi @ W
            b = Wi @ b + bi
        ws.append(W)
        bs.append(b)
    return jnp.stack(ws), jnp.stack(bs)


def _mlp_chain_kernel(w_ref, b_ref, x_ref, o_ref):
    """One batch tile of the 4-stage composed affine chain, all on the VPU/EUP.

    w_ref : SMEM (16,) composed stage weights, W[s][out, in] flattened
    b_ref : SMEM (8,)  composed stage biases,  b[s][out]   flattened
    x_ref : VMEM (FEAT, tile_rows, 128) — dense per-feature planes
    o_ref : VMEM (FEAT, tile_rows, 128)
    """
    y0 = x_ref[0].astype(jnp.float32)   # (tile_rows, 128), feature 0 plane
    y1 = x_ref[1].astype(jnp.float32)   # (tile_rows, 128), feature 1 plane
    for s in range(NUM_STAGES):         # tiny static unroll
        w00 = w_ref[4 * s + 0]          # W[s][0, 0]
        w01 = w_ref[4 * s + 1]          # W[s][0, 1]
        w10 = w_ref[4 * s + 2]          # W[s][1, 0]
        w11 = w_ref[4 * s + 3]          # W[s][1, 1]
        b0 = b_ref[2 * s + 0]
        b1 = b_ref[2 * s + 1]
        # torch.nn.Linear: out = x @ W.T + b  (W is (out, in))
        z0 = y0 * w00 + y1 * w01 + b0
        z1 = y0 * w10 + y1 * w11 + b1
        if s % 2 == 0:                  # stages 0, 2: relu
            z0 = jnp.maximum(z0, 0.0)
            z1 = jnp.maximum(z1, 0.0)
        else:                           # stages 1, 3: sigmoid (EUP tanh form)
            z0 = 0.5 * jnp.tanh(0.5 * z0) + 0.5
            z1 = 0.5 * jnp.tanh(0.5 * z1) + 0.5
        y0, y1 = z0, z1
    o_ref[0] = y0.astype(o_ref.dtype)
    o_ref[1] = y1.astype(o_ref.dtype)


def _choose_tile_rows(rows_needed, target_rows=2048):
    """Pick the tile size (in 128-wide batch rows), a multiple of 8.

    target_rows=2048 -> 2 MiB per f32 block (2 x 2048 x 128 x 4 B), so
    double-buffered in+out stays well under every generation's VMEM budget.
    When there is enough work, cap the tile so the parallel grid keeps at
    least 2 steps (v7x megacore needs >= 2 tiles to use both TensorCores).
    """
    rows8 = ((max(rows_needed, 1) + SUBLANE - 1) // SUBLANE) * SUBLANE
    tile = min(target_rows, rows8)
    if rows8 >= 2 * SUBLANE and rows8 // tile < 2:
        half = (((rows8 + 1) // 2) + SUBLANE - 1) // SUBLANE * SUBLANE
        tile = min(tile, max(SUBLANE, half))
    return max(SUBLANE, tile)


def main_with_module_list(x, weights, biases, *, target_tile_rows=2048):
    """x: (B, 2) f32; weights: (12, 2, 2) PyTorch (out, in) layout; biases: (12, 2)."""
    B = x.shape[0]
    rows_needed = -(-B // LANE)                       # ceil(B / 128)
    tile_rows = _choose_tile_rows(rows_needed, target_tile_rows)
    n_tiles = -(-rows_needed // tile_rows)
    rows_pad = n_tiles * tile_rows
    b_pad = rows_pad * LANE

    # Compose the 12 Linear(2,2) layers into 4 affine stages (trace-time, tiny).
    w_stage, b_stage = _compose_affines(weights, biases)        # (4,2,2), (4,2)
    w_flat = w_stage.reshape(NUM_STAGES * FEAT * FEAT)          # (16,)
    b_flat = b_stage.reshape(NUM_STAGES * FEAT)                 # (8,)

    # Lane + sublane dense layout: (FEAT, rows_pad, 128) — batch fills both the
    # 128-lane axis and the sublane axis of every vreg.
    x_t = jnp.pad(x.astype(jnp.float32), ((0, b_pad - B), (0, 0))).T   # (2, b_pad)
    x_t = x_t.reshape(FEAT, rows_pad, LANE)

    out_t = pl.pallas_call(
        _mlp_chain_kernel,
        out_shape=jax.ShapeDtypeStruct((FEAT, rows_pad, LANE), jnp.float32),
        grid=(n_tiles,),
        in_specs=[
            pl.BlockSpec(memory_space=pltpu.MemorySpace.SMEM),   # composed weights
            pl.BlockSpec(memory_space=pltpu.MemorySpace.SMEM),   # composed biases
            pl.BlockSpec((FEAT, tile_rows, LANE), lambda i: (0, i, 0)),
        ],
        out_specs=pl.BlockSpec((FEAT, tile_rows, LANE), lambda i: (0, i, 0)),
        compiler_params=pltpu.CompilerParams(
            dimension_semantics=("parallel",),
            vmem_limit_bytes=32 * 1024 * 1024,
        ),
    )(w_flat, b_flat, x_t)

    return out_t.reshape(FEAT, b_pad).T[:B]                      # (B, 2)


def _reference(x, weights, biases):
    """Pure-JAX reference mirroring the PyTorch module layer by layer."""
    y = x.astype(jnp.float32)
    for i in range(NUM_LAYERS):
        y = y @ weights[i].T + biases[i]
        if i % 6 == 3:
            y = jnp.maximum(y, 0.0)
        elif i % 6 == 5:
            y = jax.nn.sigmoid(y)
    return y


if __name__ == "__main__":
    key = jax.random.PRNGKey(0)
    k_x, k_w, k_b = jax.random.split(key, 3)

    BATCH = 8
    x = jax.random.normal(k_x, (BATCH, FEAT), dtype=jnp.float32)
    # Deterministic synthetic parameters (PyTorch layout: W is (out, in)).
    weights = 0.5 * jax.random.normal(k_w, (NUM_LAYERS, FEAT, FEAT), dtype=jnp.float32)
    biases = 0.1 * jax.random.normal(k_b, (NUM_LAYERS, FEAT), dtype=jnp.float32)

    out = main_with_module_list(x, weights, biases)
    out = jax.block_until_ready(out)

    ref = _reference(x, weights, biases)
    assert out.shape == (BATCH, FEAT)
    assert jnp.allclose(out, ref, atol=1e-5, rtol=1e-5), "mismatch vs reference"

    print("KERNEL_OK")
</pallas_src>

<mosaic_0001>
module attributes {stable_mosaic.version = 11 : i64} {
  func.func @_mlp_chain_kernel(%arg0: i32, %arg1: memref<16xf32, #tpu.memory_space<smem>>, %arg2: memref<8xf32, #tpu.memory_space<smem>>, %arg3: memref<2x8x128xf32, #tpu.memory_space<vmem>>, %arg4: memref<2x8x128xf32, #tpu.memory_space<vmem>>) attributes {dimension_semantics = [#tpu.dimension_semantics<parallel>], iteration_bounds = array<i64: 1>, scalar_prefetch = 0 : i64, scratch_operands = 0 : i64, tpu.core_type = #tpu.core_type<tc>, window_params = [{transform_indices = @transform_0, window_bounds = array<i64: 16>}, {transform_indices = @transform_1, window_bounds = array<i64: 8>}, {transform_indices = @transform_2, window_bounds = array<i64: 2, 8, 128>}, {transform_indices = @transform_3, window_bounds = array<i64: 2, 8, 128>}]} {
    %c0 = arith.constant 0 : index
    %c0_0 = arith.constant 0 : index
    %c0_1 = arith.constant 0 : index
    %0 = vector.load %arg3[%c0, %c0_0, %c0_1] : memref<2x8x128xf32, #tpu.memory_space<vmem>>, vector<1x8x128xf32>
    %1 = vector.shape_cast %0 : vector<1x8x128xf32> to vector<8x128xf32>
    %c1 = arith.constant 1 : index
    %c0_2 = arith.constant 0 : index
    %c0_3 = arith.constant 0 : index
    %2 = vector.load %arg3[%c1, %c0_2, %c0_3] : memref<2x8x128xf32, #tpu.memory_space<vmem>>, vector<1x8x128xf32>
    %3 = vector.shape_cast %2 : vector<1x8x128xf32> to vector<8x128xf32>
    %c0_4 = arith.constant 0 : index
    %4 = memref.load %arg1[%c0_4] : memref<16xf32, #tpu.memory_space<smem>>
    %c1_5 = arith.constant 1 : index
    %5 = memref.load %arg1[%c1_5] : memref<16xf32, #tpu.memory_space<smem>>
    %c2 = arith.constant 2 : index
    %6 = memref.load %arg1[%c2] : memref<16xf32, #tpu.memory_space<smem>>
    %c3 = arith.constant 3 : index
    %7 = memref.load %arg1[%c3] : memref<16xf32, #tpu.memory_space<smem>>
    %c0_6 = arith.constant 0 : index
    %8 = memref.load %arg2[%c0_6] : memref<8xf32, #tpu.memory_space<smem>>
    %c1_7 = arith.constant 1 : index
    %9 = memref.load %arg2[%c1_7] : memref<8xf32, #tpu.memory_space<smem>>
    %10 = vector.broadcast %4 : f32 to vector<8x128xf32>
    %11 = arith.mulf %1, %10 : vector<8x128xf32>
    %12 = vector.broadcast %5 : f32 to vector<8x128xf32>
    %13 = arith.mulf %3, %12 : vector<8x128xf32>
    %14 = arith.addf %11, %13 : vector<8x128xf32>
    %15 = vector.broadcast %8 : f32 to vector<8x128xf32>
    %16 = arith.addf %14, %15 : vector<8x128xf32>
    %17 = vector.broadcast %6 : f32 to vector<8x128xf32>
    %18 = arith.mulf %1, %17 : vector<8x128xf32>
    %19 = vector.broadcast %7 : f32 to vector<8x128xf32>
    %20 = arith.mulf %3, %19 : vector<8x128xf32>
    %21 = arith.addf %18, %20 : vector<8x128xf32>
    %22 = vector.broadcast %9 : f32 to vector<8x128xf32>
    %23 = arith.addf %21, %22 : vector<8x128xf32>
    %cst = arith.constant 0.000000e+00 : f32
    %24 = vector.broadcast %cst : f32 to vector<8x128xf32>
    %25 = arith.maximumf %16, %24 : vector<8x128xf32>
    %cst_8 = arith.constant 0.000000e+00 : f32
    %26 = vector.broadcast %cst_8 : f32 to vector<8x128xf32>
    %27 = arith.maximumf %23, %26 : vector<8x128xf32>
    %c4 = arith.constant 4 : index
    %28 = memref.load %arg1[%c4] : memref<16xf32, #tpu.memory_space<smem>>
    %c5 = arith.constant 5 : index
    %29 = memref.load %arg1[%c5] : memref<16xf32, #tpu.memory_space<smem>>
    %c6 = arith.constant 6 : index
    %30 = memref.load %arg1[%c6] : memref<16xf32, #tpu.memory_space<smem>>
    %c7 = arith.constant 7 : index
    %31 = memref.load %arg1[%c7] : memref<16xf32, #tpu.memory_space<smem>>
    %c2_9 = arith.constant 2 : index
    %32 = memref.load %arg2[%c2_9] : memref<8xf32, #tpu.memory_space<smem>>
    %c3_10 = arith.constant 3 : index
    %33 = memref.load %arg2[%c3_10] : memref<8xf32, #tpu.memory_space<smem>>
    %34 = vector.broadcast %28 : f32 to vector<8x128xf32>
    %35 = arith.mulf %25, %34 : vector<8x128xf32>
    %36 = vector.broadcast %29 : f32 to vector<8x128xf32>
    %37 = arith.mulf %27, %36 : vector<8x128xf32>
    %38 = arith.addf %35, %37 : vector<8x128xf32>
    %39 = vector.broadcast %32 : f32 to vector<8x128xf32>
    %40 = arith.addf %38, %39 : vector<8x128xf32>
    %41 = vector.broadcast %30 : f32 to vector<8x128xf32>
    %42 = arith.mulf %25, %41 : vector<8x128xf32>
    %43 = vector.broadcast %31 : f32 to vector<8x128xf32>
    %44 = arith.mulf %27, %43 : vector<8x128xf32>
    %45 = arith.addf %42, %44 : vector<8x128xf32>
    %46 = vector.broadcast %33 : f32 to vector<8x128xf32>
    %47 = arith.addf %45, %46 : vector<8x128xf32>
    %cst_11 = arith.constant 5.000000e-01 : f32
    %48 = vector.broadcast %cst_11 : f32 to vector<8x128xf32>
    %49 = arith.mulf %48, %40 : vector<8x128xf32>
    %50 = math.tanh %49 : vector<8x128xf32>
    %cst_12 = arith.constant 5.000000e-01 : f32
    %51 = vector.broadcast %cst_12 : f32 to vector<8x128xf32>
    %52 = arith.mulf %51, %50 : vector<8x128xf32>
    %cst_13 = arith.constant 5.000000e-01 : f32
    %53 = vector.broadcast %cst_13 : f32 to vector<8x128xf32>
    %54 = arith.addf %52, %53 : vector<8x128xf32>
    %cst_14 = arith.constant 5.000000e-01 : f32
    %55 = vector.broadcast %cst_14 : f32 to vector<8x128xf32>
    %56 = arith.mulf %55, %47 : vector<8x128xf32>
    %57 = math.tanh %56 : vector<8x128xf32>
    %cst_15 = arith.constant 5.000000e-01 : f32
    %58 = vector.broadcast %cst_15 : f32 to vector<8x128xf32>
    %59 = arith.mulf %58, %57 : vector<8x128xf32>
    %cst_16 = arith.constant 5.000000e-01 : f32
    %60 = vector.broadcast %cst_16 : f32 to vector<8x128xf32>
    %61 = arith.addf %59, %60 : vector<8x128xf32>
    %c8 = arith.constant 8 : index
    %62 = memref.load %arg1[%c8] : memref<16xf32, #tpu.memory_space<smem>>
    %c9 = arith.constant 9 : index
    %63 = memref.load %arg1[%c9] : memref<16xf32, #tpu.memory_space<smem>>
    %c10 = arith.constant 10 : index
    %64 = memref.load %arg1[%c10] : memref<16xf32, #tpu.memory_space<smem>>
    %c11 = arith.constant 11 : index
    %65 = memref.load %arg1[%c11] : memref<16xf32, #tpu.memory_space<smem>>
    %c4_17 = arith.constant 4 : index
    %66 = memref.load %arg2[%c4_17] : memref<8xf32, #tpu.memory_space<smem>>
    %c5_18 = arith.constant 5 : index
    %67 = memref.load %arg2[%c5_18] : memref<8xf32, #tpu.memory_space<smem>>
    %68 = vector.broadcast %62 : f32 to vector<8x128xf32>
    %69 = arith.mulf %54, %68 : vector<8x128xf32>
    %70 = vector.broadcast %63 : f32 to vector<8x128xf32>
    %71 = arith.mulf %61, %70 : vector<8x128xf32>
    %72 = arith.addf %69, %71 : vector<8x128xf32>
    %73 = vector.broadcast %66 : f32 to vector<8x128xf32>
    %74 = arith.addf %72, %73 : vector<8x128xf32>
    %75 = vector.broadcast %64 : f32 to vector<8x128xf32>
    %76 = arith.mulf %54, %75 : vector<8x128xf32>
    %77 = vector.broadcast %65 : f32 to vector<8x128xf32>
    %78 = arith.mulf %61, %77 : vector<8x128xf32>
    %79 = arith.addf %76, %78 : vector<8x128xf32>
    %80 = vector.broadcast %67 : f32 to vector<8x128xf32>
    %81 = arith.addf %79, %80 : vector<8x128xf32>
    %cst_19 = arith.constant 0.000000e+00 : f32
    %82 = vector.broadcast %cst_19 : f32 to vector<8x128xf32>
    %83 = arith.maximumf %74, %82 : vector<8x128xf32>
    %cst_20 = arith.constant 0.000000e+00 : f32
    %84 = vector.broadcast %cst_20 : f32 to vector<8x128xf32>
    %85 = arith.maximumf %81, %84 : vector<8x128xf32>
    %c12 = arith.constant 12 : index
    %86 = memref.load %arg1[%c12] : memref<16xf32, #tpu.memory_space<smem>>
    %c13 = arith.constant 13 : index
    %87 = memref.load %arg1[%c13] : memref<16xf32, #tpu.memory_space<smem>>
    %c14 = arith.constant 14 : index
    %88 = memref.load %arg1[%c14] : memref<16xf32, #tpu.memory_space<smem>>
    %c15 = arith.constant 15 : index
    %89 = memref.load %arg1[%c15] : memref<16xf32, #tpu.memory_space<smem>>
    %c6_21 = arith.constant 6 : index
    %90 = memref.load %arg2[%c6_21] : memref<8xf32, #tpu.memory_space<smem>>
    %c7_22 = arith.constant 7 : index
    %91 = memref.load %arg2[%c7_22] : memref<8xf32, #tpu.memory_space<smem>>
    %92 = vector.broadcast %86 : f32 to vector<8x128xf32>
    %93 = arith.mulf %83, %92 : vector<8x128xf32>
    %94 = vector.broadcast %87 : f32 to vector<8x128xf32>
    %95 = arith.mulf %85, %94 : vector<8x128xf32>
    %96 = arith.addf %93, %95 : vector<8x128xf32>
    %97 = vector.broadcast %90 : f32 to vector<8x128xf32>
    %98 = arith.addf %96, %97 : vector<8x128xf32>
    %99 = vector.broadcast %88 : f32 to vector<8x128xf32>
    %100 = arith.mulf %83, %99 : vector<8x128xf32>
    %101 = vector.broadcast %89 : f32 to vector<8x128xf32>
    %102 = arith.mulf %85, %101 : vector<8x128xf32>
    %103 = arith.addf %100, %102 : vector<8x128xf32>
    %104 = vector.broadcast %91 : f32 to vector<8x128xf32>
    %105 = arith.addf %103, %104 : vector<8x128xf32>
    %cst_23 = arith.constant 5.000000e-01 : f32
    %106 = vector.broadcast %cst_23 : f32 to vector<8x128xf32>
    %107 = arith.mulf %106, %98 : vector<8x128xf32>
    %108 = math.tanh %107 : vector<8x128xf32>
    %cst_24 = arith.constant 5.000000e-01 : f32
    %109 = vector.broadcast %cst_24 : f32 to vector<8x128xf32>
    %110 = arith.mulf %109, %108 : vector<8x128xf32>
    %cst_25 = arith.constant 5.000000e-01 : f32
    %111 = vector.broadcast %cst_25 : f32 to vector<8x128xf32>
    %112 = arith.addf %110, %111 : vector<8x128xf32>
    %cst_26 = arith.constant 5.000000e-01 : f32
    %113 = vector.broadcast %cst_26 : f32 to vector<8x128xf32>
    %114 = arith.mulf %113, %105 : vector<8x128xf32>
    %115 = math.tanh %114 : vector<8x128xf32>
    %cst_27 = arith.constant 5.000000e-01 : f32
    %116 = vector.broadcast %cst_27 : f32 to vector<8x128xf32>
    %117 = arith.mulf %116, %115 : vector<8x128xf32>
    %cst_28 = arith.constant 5.000000e-01 : f32
    %118 = vector.broadcast %cst_28 : f32 to vector<8x128xf32>
    %119 = arith.addf %117, %118 : vector<8x128xf32>
    %c0_29 = arith.constant 0 : index
    %c0_30 = arith.constant 0 : index
    %c0_31 = arith.constant 0 : index
    %120 = vector.load %arg4[%c0_29, %c0_30, %c0_31] : memref<2x8x128xf32, #tpu.memory_space<vmem>>, vector<1x8x128xf32>
    %121 = vector.shape_cast %120 : vector<1x8x128xf32> to vector<8x128xf32>
    %122 = vector.shape_cast %112 : vector<8x128xf32> to vector<1x8x128xf32>
    tpu.vector_store %arg4[%c0_29, %c0_30, %c0_31], %122 {strides = array<i32>} : memref<2x8x128xf32, #tpu.memory_space<vmem>>, vector<1x8x128xf32>,
    %c1_32 = arith.constant 1 : index
    %c0_33 = arith.constant 0 : index
    %c0_34 = arith.constant 0 : index
    %123 = vector.load %arg4[%c1_32, %c0_33, %c0_34] : memref<2x8x128xf32, #tpu.memory_space<vmem>>, vector<1x8x128xf32>
    %124 = vector.shape_cast %123 : vector<1x8x128xf32> to vector<8x128xf32>
    %125 = vector.shape_cast %119 : vector<8x128xf32> to vector<1x8x128xf32>
    tpu.vector_store %arg4[%c1_32, %c0_33, %c0_34], %125 {strides = array<i32>} : memref<2x8x128xf32, #tpu.memory_space<vmem>>, vector<1x8x128xf32>,
    return
  }
  func.func @transform_0(%arg0: i32) -> i32 {
    %c0_i32 = arith.constant 0 : i32
    %c0_i32_0 = arith.constant 0 : i32
    return %c0_i32 : i32
  }
  func.func @transform_1(%arg0: i32) -> i32 {
    %c0_i32 = arith.constant 0 : i32
    %c0_i32_0 = arith.constant 0 : i32
    return %c0_i32 : i32
  }
  func.func @transform_2(%arg0: i32) -> (i32, i32, i32) {
    %c0_i32 = arith.constant 0 : i32
    %c0_i32_0 = arith.constant 0 : i32
    %c0_i32_1 = arith.constant 0 : i32
    return %c0_i32, %arg0, %c0_i32_0 : i32, i32, i32
  }
  func.func @transform_3(%arg0: i32) -> (i32, i32, i32) {
    %c0_i32 = arith.constant 0 : i32
    %c0_i32_0 = arith.constant 0 : i32
    %c0_i32_1 = arith.constant 0 : i32
    return %c0_i32, %arg0, %c0_i32_0 : i32, i32, i32
  }
}

</mosaic_0001>

<bundles_post_ra>
// kernel: tpu_custom_call.1
= control target key start
LH: loop header
LB: loop body
LE: loop exit
PB: predicated region body
PF: predicated region fallthrough
CT: control target
= control target key end

     0   :  { %8 = vsyncpa [#allocation5], 0  ;;  %s358_s0 = inlined_call_operand.hbm [shape: f32[16], index: 0, kind: input, shape index: {}]   ;;  %s359_s1 = inlined_call_operand.vmem [shape: f32[8], index: 1, kind: input, shape index: {}]   ;;  %s360_s2 = inlined_call_operand.hbm [shape: f32[2,8,128], index: 2, kind: input, shape index: {}]   ;;  %s361_s3 = inlined_call_operand.hbm [shape: f32[2,8,128], index: 3, kind: output, shape index: {}]  }
   0x1   :  { %9 = vsyncpa [#allocation6], 0 }
   0x2   :  { %10 = vsyncpa [#allocation3], 0 }
   0x3   :  { %11 = vsyncpa [#allocation4], 0  ;;  %s26_s14 = sshll.u32 %s359_s1, 4  ;;  %s213_s17 = scalar_lea.hbm %s358_s0, 16  ;;  %s27_s14 = int_to_ptr.vmem [resolvable:$true] %s26_s14 }
   0x4   :  { %p214_p0 = scmp.ne.s32.totalorder %s358_s0, %s213_s17  ;;  %p217_p1 = scmp.lt.u32.totalorder %s213_s17, %s358_s0 }
   0x6   :  { %p219_p2 = pnand %p217_p1, %p214_p0 }
   0x8   :  { %222 = shalt.err (!%p219_p2)
}
   0x9   :  { %s287_s22 = smov [#allocation2]   ;;  %s223_s1 = scalar_lea.vmem %s27_s14, 16 }
   0xa   :  { %19 = dma.hbm_to_smem %s358_s0, 16, %s287_s22, [#allocation5]  }
   0xb   :  { %p224_p3 = scmp.ne.s32.totalorder %s27_s14, %s223_s1  ;;  %p228_p4 = scmp.lt.s32.totalorder %s27_s14, %s27_s14 }
   0xc   :  { %p229_p5 = scmp.lt.s32.totalorder %s223_s1, %s223_s1 }
   0xe   :  { %p230_p6 = por %p229_p5, %p228_p4 }
  0x10   :  { %p231_p7 = pnand %p230_p6, %p224_p3 }
  0x12   :  { %234 = shalt.err (!%p231_p7)
}
  0x13   :  { %s288_s25 = smov [#allocation7]   ;;  %s289_s26 = smov [#allocation8]  }
  0x14   :  { %29 = dma.vmem_to_smem %s27_s14, 16, %s288_s25, [#allocation6]  }
  0x15   :  { %s35_s27 = sshll.u32 %s289_s26, 4  ;;  %s235_s30 = scalar_lea.hbm %s360_s2, 256  ;;  %s36_s27 = int_to_ptr.vmem [resolvable:$true] %s35_s27 }
  0x16   :  { %p236_p8 = scmp.ne.s32.totalorder %s360_s2, %s235_s30  ;;  %p239_p9 = scmp.lt.u32.totalorder %s235_s30, %s360_s2 }
  0x18   :  { %p241_p10 = pnand %p239_p9, %p236_p8 }
  0x1a   :  { %244 = shalt.err (!%p241_p10)
}
  0x1b   :  { %s245_s7 = scalar_lea.vmem %s36_s27, 256  ;;  %p250_p12 = scmp.lt.s32.totalorder %s36_s27, %s36_s27 }
  0x1c   :  { %p246_p11 = scmp.ne.s32.totalorder %s36_s27, %s245_s7  ;;  %p251_p13 = scmp.lt.s32.totalorder %s245_s7, %s245_s7 }
  0x1e   :  { %p252_p0 = por %p251_p13, %p250_p12 }
  0x20   :  { %p253_p1 = pnand %p252_p0, %p246_p11 }
  0x22   :  { %256 = shalt.err (!%p253_p1)
}
  0x23   :  { %s290_s8 = smov 128   ;;  %s291_s9 = smov 8  }
  0x24   :  { %41 = dma.hbm_to_vmem [thread:$0]  %s360_s2, 256, %s36_s27, [#allocation3], %s290_s8, %s290_s8, %s291_s9  }
  0x25   :  { %279 = dma.done.wait [#allocation5], 16  }
  0x26   :  { %280 = vsyncadd [#allocation5], 4294967280 }
  0x27   :  { %281 = dma.done.wait [#allocation6], 16  }
  0x28   :  { %282 = vsyncadd [#allocation6], 4294967280 }
  0x29   :  { %283 = dma.done.wait [#allocation3], 256  }
  0x2a   :  { %284 = vsyncadd [#allocation3], 4294967040 }
  0x2b   :  { %51 = sfence }
  0x2c   :  { %s55_s12 = sld [smem:[#allocation2]]  ;;  %s177_s13 = sld [smem:[#allocation2 + $0x1]]  ;;  %v52_v0 = vld [vmem:[#allocation8] sm:$0xff]  ;;  %v54_v1 = vld [vmem:[#allocation8 + $0x8] sm:$0xff] }
  0x2d   :  { %s178_s14 = sld [smem:[#allocation2 + $0x2]]  ;;  %s179_s15 = sld [smem:[#allocation2 + $0x3]] }
  0x2e   :  { %s59_s16 = sld [smem:[#allocation7]]  ;;  %s180_s17 = sld [smem:[#allocation7 + $0x1]] }
  0x2f   :  { %s181_s18 = sld [smem:[#allocation2 + $0x4]]  ;;  %s183_s19 = sld [smem:[#allocation2 + $0x6]] }
  0x30   :  { %s182_s20 = sld [smem:[#allocation2 + $0x5]]  ;;  %s184_s21 = sld [smem:[#allocation2 + $0x7]] }
  0x31   :  { %s185_s2 = sld [smem:[#allocation7 + $0x2]]  ;;  %s186_s22 = sld [smem:[#allocation7 + $0x3]] }
  0x32   :  { %v61_v2 = vstv %s55_s12  ;;  %v63_v3 = vstv %s177_s13  ;;  %s187_s23 = sld [smem:[#allocation2 + $0x8]]  ;;  %s189_s24 = sld [smem:[#allocation2 + $0xa]] }
  0x33   :  { %v62_v4 = vmul.f32 %v61_v2, %v52_v0  ;;  %v64_v5 = vmul.f32 %v63_v3, %v54_v1  ;;  %v68_v6 = vstv %s178_s14  ;;  %v70_v7 = vstv %s179_s15  ;;  %s188_s1 = sld [smem:[#allocation2 + $0x9]]  ;;  %s190_s25 = sld [smem:[#allocation2 + $0xb]] }
  0x34   :  { %v66_v8 = vstv %s59_s16  ;;  %v69_v9 = vmul.f32 %v68_v6, %v52_v0  ;;  %v71_v10 = vmul.f32 %v70_v7, %v54_v1  ;;  %v73_v12 = vstv %s180_s17  ;;  %s191_s26 = sld [smem:[#allocation7 + $0x4]]  ;;  %s192_s27 = sld [smem:[#allocation7 + $0x5]] }
  0x35   :  { %v65_v11 = vadd.f32 %v64_v5, %v62_v4  ;;  %v83_v16 = vstv %s181_s18  ;;  %v90_v17 = vstv %s183_s19  ;;  %s193_s28 = sld [smem:[#allocation2 + $0xc]]  ;;  %s194_s29 = sld [smem:[#allocation2 + $0xd]] }
  0x36   :  { %v72_v13 = vadd.f32 %v71_v10, %v69_v9  ;;  %v85_v19 = vstv %s182_s20  ;;  %v92_v20 = vstv %s184_s21  ;;  %s195_s30 = sld [smem:[#allocation2 + $0xe]]  ;;  %s196_s4 = sld [smem:[#allocation2 + $0xf]] }
  0x37   :  { %v67_v14 = vadd.f32 %v66_v8, %v65_v11  ;;  %v88_v26 = vstv %s185_s2  ;;  %v95_v27 = vstv %s186_s22  ;;  %s197_s5 = sld [smem:[#allocation7 + $0x6]]  ;;  %s198_s0 = sld [smem:[#allocation7 + $0x7]] }
  0x38   :  { %v74_v15 = vadd.f32 %v73_v12, %v72_v13  ;;  %v111_v38 = vstv %s187_s23  ;;  %v118_v39 = vstv %s189_s24  ;;  %s292_s6 = smov [#allocation9]  }
  0x39   :  { %v75_v18 = vmax.f32 %v67_v14, 0.0  ;;  %v113_v41 = vstv %s188_s1  ;;  %v120_v42 = vstv %s190_s25  ;;  %s163_s7 = sshll.u32 %s292_s6, 4  ;;  %s164_s7 = int_to_ptr.vmem [resolvable:$true] %s163_s7 }
  0x3a   :  { %v76_v21 = vmax.f32 %v74_v15, 0.0  ;;  %v116_v48 = vstv %s191_s26  ;;  %v123_v49 = vstv %s192_s27  ;;  %s257_s10 = scalar_lea.vmem %s164_s7, 256  ;;  %p262_p3 = scmp.lt.s32.totalorder %s164_s7, %s164_s7 }
  0x3b   :  { %v84_v22 = vmul.f32 %v83_v16, %v75_v18  ;;  %v91_v23 = vmul.f32 %v90_v17, %v75_v18  ;;  %v133_v54 = vstv %s193_s28  ;;  %v135_v55 = vstv %s194_s29  ;;  %p258_p2 = scmp.ne.s32.totalorder %s164_s7, %s257_s10  ;;  %p263_p4 = scmp.lt.s32.totalorder %s257_s10, %s257_s10 }
  0x3c   :  { %v86_v24 = vmul.f32 %v85_v19, %v76_v21  ;;  %v93_v25 = vmul.f32 %v92_v20, %v76_v21  ;;  %v140_v56 = vstv %s195_s30  ;;  %v142_v57 = vstv %s196_s4 }
  0x3d   :  { %v138_v0 = vstv %s197_s5  ;;  %v145_v1 = vstv %s198_s0  ;;  %p264_p5 = por %p263_p4, %p262_p3 }
  0x3e   :  { %v87_v28 = vadd.f32 %v86_v24, %v84_v22  ;;  %v94_v29 = vadd.f32 %v93_v25, %v91_v23 }
  0x3f   :  { %p265_p6 = pnand %p264_p5, %p258_p2 }
  0x40   :  { %v89_v30 = vadd.f32 %v88_v26, %v87_v28  ;;  %v96_v31 = vadd.f32 %v95_v27, %v94_v29 }
  0x42   :  { %v97_v32 = vmul.f32 0.5, %v89_v30  ;;  %v101_v33 = vmul.f32 0.5, %v96_v31 }
  0x44   :  { %205 = vtanh.f32 %v97_v32 }
  0x45   :  { %207 = vtanh.f32 %v101_v33 }
  0x4e   :  { %v206_v34 = vpop.eup %205 }
  0x4f   :  { %v208_v35 = vpop.eup %207  ;;  %v99_v36 = vmul.f32 0.5, %v206_v34 }
  0x50   :  { %v103_v37 = vmul.f32 0.5, %v208_v35 }
  0x51   :  { %v100_v40 = vadd.f32 0.5, %v99_v36 }
  0x52   :  { %v104_v43 = vadd.f32 0.5, %v103_v37 }
  0x53   :  { %v112_v44 = vmul.f32 %v111_v38, %v100_v40  ;;  %v119_v45 = vmul.f32 %v118_v39, %v100_v40 }
  0x54   :  { %v114_v46 = vmul.f32 %v113_v41, %v104_v43  ;;  %v121_v47 = vmul.f32 %v120_v42, %v104_v43 }
  0x56   :  { %v115_v50 = vadd.f32 %v114_v46, %v112_v44  ;;  %v122_v51 = vadd.f32 %v121_v47, %v119_v45 }
  0x58   :  { %v117_v52 = vadd.f32 %v116_v48, %v115_v50  ;;  %v124_v53 = vadd.f32 %v123_v49, %v122_v51 }
  0x5a   :  { %v125_v58 = vmax.f32 %v117_v52, 0.0  ;;  %v126_v59 = vmax.f32 %v124_v53, 0.0 }
  0x5c   :  { %v134_v60 = vmul.f32 %v133_v54, %v125_v58  ;;  %v136_v61 = vmul.f32 %v135_v55, %v126_v59  ;;  %v141_v62 = vmul.f32 %v140_v56, %v125_v58  ;;  %v143_v63 = vmul.f32 %v142_v57, %v126_v59 }
  0x5e   :  { %v137_v2 = vadd.f32 %v136_v61, %v134_v60  ;;  %v144_v3 = vadd.f32 %v143_v63, %v141_v62 }
  0x60   :  { %v139_v4 = vadd.f32 %v138_v0, %v137_v2  ;;  %v146_v5 = vadd.f32 %v145_v1, %v144_v3 }
  0x62   :  { %v147_v6 = vmul.f32 0.5, %v139_v4  ;;  %v151_v7 = vmul.f32 0.5, %v146_v5 }
  0x64   :  { %209 = vtanh.f32 %v147_v6 }
  0x65   :  { %211 = vtanh.f32 %v151_v7 }
  0x6e   :  { %v210_v8 = vpop.eup %209 }
  0x6f   :  { %v212_v9 = vpop.eup %211  ;;  %v149_v10 = vmul.f32 0.5, %v210_v8 }
  0x70   :  { %v153_v11 = vmul.f32 0.5, %v212_v9 }
  0x71   :  { %v150_v12 = vadd.f32 0.5, %v149_v10 }
  0x72   :  { %v154_v13 = vadd.f32 0.5, %v153_v11 }
  0x73   :  { %155 = vst [vmem:[#allocation9] sm:$0xff] %v150_v12 }
  0x74   :  { %157 = vst [vmem:[#allocation9 + $0x8] sm:$0xff] %v154_v13 }
  0x75   :  { %268 = shalt.err (!%p265_p6)
}
  0x76   :  { %s269_s13 = scalar_lea.hbm %s361_s3, 256 }
  0x77   :  { %p270_p7 = scmp.ne.s32.totalorder %s361_s3, %s269_s13  ;;  %p273_p8 = scmp.lt.u32.totalorder %s269_s13, %s361_s3 }
  0x79   :  { %p275_p9 = pnand %p273_p8, %p270_p7 }
  0x7b   :  { %278 = shalt.err (!%p275_p9)
}
  0x7c   :  { %169 = dma.vmem_to_hbm [thread:$0]  %s164_s7, 256, %s361_s3, [#allocation4], %s290_s8, %s290_s8, %s291_s9  }
  0x7d   :  { %285 = dma.done.wait [#allocation4], 256  }
  0x7e   :  { %286 = vsyncadd [#allocation4], 4294967040 }
  0x7f   :  { %173 = vsyncpa [#allocation3], 1 }
  0x80   :  { %174 = vsyncpa [#allocation4], 1 }
  0x81   :  { %175 = vsyncpa [#allocation5], 1 }
  0x82   :  { %176 = vsyncpa [#allocation6], 1 }

</bundles_post_ra>
